<compile_context>
chip_gen: v7x
topology: tpu7x:2x2x1
jax: 0.10.0
libtpu: 0.0.40
codegen_flags: <defaults>
</compile_context>

<pallas_src>
import jax
import jax.numpy as jnp
from jax.experimental import pallas as pl
from jax.experimental.pallas import tpu as pltpu


def _round_up(x: int, m: int) -> int:
    return ((x + m - 1) // m) * m


# ----------------------------- kernel ---------------------------------------


def _swish(x):
    # x * sigmoid(x), sigmoid via tanh -> runs on the EUP slot, no VPU divide.
    return x * (0.5 * jnp.tanh(0.5 * x) + 0.5)


def _softplus(x):
    # numerically-stable softplus
    return jnp.maximum(x, 0.0) + jnp.log1p(jnp.exp(-jnp.abs(x)))


def _ensemble_forward_kernel(
    data_ref,      # (TILE_B, Din)     f32  (StandardScaler folded into layer 1)
    w1_ref,        # (Din, Hpad)       bf16
    w234_ref,      # (3, Hpad, Hpad)   bf16  nn2..nn4 stacked
    wh_ref,        # (Hpad, 2*Dpad)    bf16  [mean | logvar] heads fused
    b1234_ref,     # (4, 1, Hpad)      f32   biases of nn1..nn4 stacked
    bh_ref,        # (1, 2*Dpad)       f32
    bounds_ref,    # (3, Dpad)         f32   rows: max_logvar, min_logvar, exp(min_logvar)
    mean_out_ref,  # (TILE_B, Dpad)    f32
    var_out_ref,   # (TILE_B, Dpad)    f32
):
    bf16 = jnp.bfloat16
    dpad = mean_out_ref.shape[-1]

    # layer 1 (scaler folded in); bf16 operands -> f32 accumulation
    h = jnp.dot(data_ref[...].astype(bf16), w1_ref[...],
                preferred_element_type=jnp.float32) + b1234_ref[0]
    h = _swish(h)

    # layers 2..4 (static unroll)
    for i in range(3):
        h = jnp.dot(h.astype(bf16), w234_ref[i],
                    preferred_element_type=jnp.float32) + b1234_ref[i + 1]
        h = _swish(h)

    # fused mean/logvar head: one N = 2*Dpad matmul, lane-aligned split
    o = jnp.dot(h.astype(bf16), wh_ref[...],
                preferred_element_type=jnp.float32) + bh_ref[...]
    mean = o[:, :dpad]
    raw_lv = o[:, dpad:]

    max_lv = bounds_ref[0:1, :]
    min_lv = bounds_ref[1:2, :]
    exp_min_lv = bounds_ref[2:3, :]

    # upper clamp
    lv1 = max_lv - _softplus(max_lv - raw_lv)
    # lower clamp fused with the final exp:
    #   exp(min + softplus(lv1 - min)) = exp(min) * (1 + exp(lv1 - min))
    # exponent bounded by max_lv - min_lv (~10.5) -> safe in f32.
    var = exp_min_lv * (1.0 + jnp.exp(lv1 - min_lv))

    mean_out_ref[...] = mean
    var_out_ref[...] = var


# ----------------------------- wrapper ---------------------------------------


def ensemble_model_forward(data, scaler_mean, scaler_std, params,
                           max_logvar, min_logvar):
    """Pallas implementation of EnsembleModel.forward (ret_log_var=False).

    data: (E, B, Din); scaler_mean/std: (1, Din); returns (mean, var), each (E, B, Dout).
    """
    E, B, Din = data.shape
    H = params["w1"].shape[-1]
    Dout2 = params["w5"].shape[-1]
    Dout = Dout2 // 2

    Hpad = _round_up(H, 128)      # MXU-aligned hidden width
    Dpad = _round_up(Dout, 128)   # lane-dense output width

    f32 = jnp.float32
    bf16 = jnp.bfloat16

    def pad_to(x, axis, target):
        if x.shape[axis] == target:
            return x
        pad = [(0, 0)] * x.ndim
        pad[axis] = (0, target - x.shape[axis])
        return jnp.pad(x, pad)

    # ---- fold StandardScaler into layer 1:  (x - m)/s @ W1 + b1
    #      = x @ (W1 * (1/s)[:,None]) + (b1 - (m/s) @ W1)
    inv_std = (1.0 / scaler_std).astype(f32)                                 # (1, Din)
    w1f = params["w1"].astype(f32)
    w1 = w1f * inv_std[0][None, :, None]                                     # (E, Din, H)
    b1 = params["b1"].astype(f32) - jnp.einsum(
        "d,edh->eh", (scaler_mean * inv_std)[0].astype(f32), w1f
    )[:, None, :]                                                            # (E, 1, H)

    # ---- pad hidden dim, cast MXU operands to bf16
    w1 = pad_to(w1, 2, Hpad).astype(bf16)                                    # (E, Din, Hpad)
    b1 = pad_to(b1, 2, Hpad)                                                 # (E, 1, Hpad)

    w234 = jnp.stack(
        [pad_to(pad_to(params[f"w{i}"].astype(f32), 1, Hpad), 2, Hpad) for i in (2, 3, 4)],
        axis=1,
    ).astype(bf16)                                                           # (E, 3, Hpad, Hpad)
    b1234 = jnp.stack(
        [b1] + [pad_to(params[f"b{i}"].astype(f32), 2, Hpad) for i in (2, 3, 4)],
        axis=1,
    )                                                                        # (E, 4, 1, Hpad)

    # ---- fused, lane-padded [mean | logvar] head
    w5 = params["w5"].astype(f32)
    b5 = params["b5"].astype(f32)
    w_heads = jnp.concatenate(
        [pad_to(pad_to(w5[:, :, :Dout], 2, Dpad), 1, Hpad),
         pad_to(pad_to(w5[:, :, Dout:], 2, Dpad), 1, Hpad)],
        axis=2,
    ).astype(bf16)                                                           # (E, Hpad, 2*Dpad)
    b_heads = jnp.concatenate(
        [pad_to(b5[:, :, :Dout], 2, Dpad), pad_to(b5[:, :, Dout:], 2, Dpad)],
        axis=2,
    )                                                                        # (E, 1, 2*Dpad)

    max_lv = pad_to(max_logvar.astype(f32), 1, Dpad)
    min_lv = pad_to(min_logvar.astype(f32), 1, Dpad)
    bounds = jnp.concatenate([max_lv, min_lv, jnp.exp(min_lv)], axis=0)      # (3, Dpad)

    # ---- batch tiling: B innermost so weight blocks are not re-DMA'd per tile.
    if B >= 512:
        tile_b = 512
    else:
        tile_b = _round_up(B, 8)
    B_pad = _round_up(B, tile_b)
    data_p = data.astype(f32)
    if B_pad != B:
        data_p = jnp.pad(data_p, ((0, 0), (0, B_pad - B), (0, 0)))
    n_bt = B_pad // tile_b

    grid_spec = pltpu.PrefetchScalarGridSpec(
        num_scalar_prefetch=0,
        grid=(E, n_bt),
        in_specs=[
            pl.BlockSpec((pl.Squeezed(), tile_b, Din), lambda e, bt: (e, bt, 0)),       # data
            pl.BlockSpec((pl.Squeezed(), Din, Hpad), lambda e, bt: (e, 0, 0)),          # w1
            pl.BlockSpec((pl.Squeezed(), 3, Hpad, Hpad), lambda e, bt: (e, 0, 0, 0)),   # w2..w4
            pl.BlockSpec((pl.Squeezed(), Hpad, 2 * Dpad), lambda e, bt: (e, 0, 0)),     # heads W
            pl.BlockSpec((pl.Squeezed(), 4, 1, Hpad), lambda e, bt: (e, 0, 0, 0)),      # b1..b4
            pl.BlockSpec((pl.Squeezed(), 1, 2 * Dpad), lambda e, bt: (e, 0, 0)),        # heads b
            pl.BlockSpec((3, Dpad), lambda e, bt: (0, 0)),                              # bounds
        ],
        out_specs=[
            pl.BlockSpec((pl.Squeezed(), tile_b, Dpad), lambda e, bt: (e, bt, 0)),  # mean
            pl.BlockSpec((pl.Squeezed(), tile_b, Dpad), lambda e, bt: (e, bt, 0)),  # var
        ],
    )

    # advisory cost estimate for XLA scheduling
    flops = 2 * E * B_pad * (Din * Hpad + 3 * Hpad * Hpad + Hpad * 2 * Dpad)
    transcendentals = E * B_pad * (4 * Hpad + 3 * Dpad)
    bytes_accessed = (
        data_p.size * 4 + w1.size * 2 + w234.size * 2 + w_heads.size * 2
        + b1234.size * 4 + b_heads.size * 4 + bounds.size * 4
        + 2 * E * B_pad * Dpad * 4
    )
    cost = pl.CostEstimate(
        flops=int(flops),
        transcendentals=int(transcendentals),
        bytes_accessed=int(bytes_accessed),
    )

    mean_p, var_p = pl.pallas_call(
        _ensemble_forward_kernel,
        grid_spec=grid_spec,
        out_shape=(
            jax.ShapeDtypeStruct((E, B_pad, Dpad), f32),
            jax.ShapeDtypeStruct((E, B_pad, Dpad), f32),
        ),
        compiler_params=pltpu.CompilerParams(
            dimension_semantics=("parallel", "parallel"),
        ),
        cost_estimate=cost,
    )(data_p, w1, w234, w_heads, b1234, b_heads, bounds)

    # strip batch + lane padding outside the kernel (cheap XLA slice)
    return mean_p[:, :B, :Dout], var_p[:, :B, :Dout]


# ------------------------ parameter construction -----------------------------


def init_ensemble_params(key, state_size, action_size, reward_size, cost_size,
                         ensemble_size, hidden_size, predict_reward, predict_cost):
    """Deterministic init mirroring EnsembleModel.__init__:
    truncated-normal weights (std = 1/(2*sqrt(in_features)), clipped at 2*std),
    zero biases.
    """
    in_dim = state_size + action_size
    out_dim = state_size + (reward_size if predict_reward else 0) \
                         + (cost_size if predict_cost else 0)

    layer_dims = [
        (in_dim, hidden_size),
        (hidden_size, hidden_size),
        (hidden_size, hidden_size),
        (hidden_size, hidden_size),
        (hidden_size, out_dim * 2),
    ]

    params = {}
    keys = jax.random.split(key, len(layer_dims))
    for i, ((fan_in, fan_out), k) in enumerate(zip(layer_dims, keys), start=1):
        std = 1.0 / (2.0 * jnp.sqrt(float(fan_in)))
        w = jax.random.truncated_normal(
            k, -2.0, 2.0, (ensemble_size, fan_in, fan_out), dtype=jnp.float32
        ) * std
        b = jnp.zeros((ensemble_size, 1, fan_out), dtype=jnp.float32)
        params[f"w{i}"] = w
        params[f"b{i}"] = b

    max_logvar = jnp.ones((1, out_dim), dtype=jnp.float32) / 2.0
    min_logvar = -jnp.ones((1, out_dim), dtype=jnp.float32) * 10.0
    return params, max_logvar, min_logvar, out_dim


# ------------------------------- reference -----------------------------------


def _reference_forward(data, smean, sstd, params, max_lv, min_lv, out_dim):
    x = (data - smean[None]) / sstd[None]

    def fc(h, w, b):
        return jnp.einsum("ebi,eio->ebo", h, w) + b

    def sp(v):
        return jnp.maximum(v, 0.0) + jnp.log1p(jnp.exp(-jnp.abs(v)))

    h = x
    for i in range(1, 5):
        h = fc(h, params[f"w{i}"], params[f"b{i}"])
        h = h * jax.nn.sigmoid(h)
    o = fc(h, params["w5"], params["b5"])
    mean = o[:, :, :out_dim]
    lv = max_lv - sp(max_lv - o[:, :, out_dim:])
    lv = min_lv + sp(lv - min_lv)
    return mean, jnp.exp(lv)


# --------------------------------- main ---------------------------------------


if __name__ == "__main__":
    # small shapes consistent with the module
    state_size = 8
    action_size = 4
    reward_size = 1
    cost_size = 1
    ensemble_size = 4
    hidden_size = 32
    batch = 8
    predict_reward = True
    predict_cost = False

    key = jax.random.PRNGKey(0)
    k_param, k_data, k_smean, k_sstd = jax.random.split(key, 4)

    params, max_logvar, min_logvar, out_dim = init_ensemble_params(
        k_param, state_size, action_size, reward_size, cost_size,
        ensemble_size, hidden_size, predict_reward, predict_cost,
    )

    in_dim = state_size + action_size
    data = jax.random.normal(
        k_data, (ensemble_size, batch, in_dim), dtype=jnp.float32
    )

    # non-trivial StandardScaler parameters (exercises the scaler-folding path);
    # std kept strictly positive as in StandardScaler.fit.
    scaler_mean = 0.5 * jax.random.normal(k_smean, (1, in_dim), dtype=jnp.float32)
    scaler_std = 0.5 + jax.random.uniform(k_sstd, (1, in_dim), dtype=jnp.float32)

    mean, var = ensemble_model_forward(
        data, scaler_mean, scaler_std, params, max_logvar, min_logvar
    )
    jax.block_until_ready((mean, var))

    # sanity check vs pure-JAX f32 reference (tolerance loosened for bf16 MXU operands)
    ref_mean, ref_var = _reference_forward(
        data, scaler_mean, scaler_std, params, max_logvar, min_logvar, out_dim
    )
    assert mean.shape == (ensemble_size, batch, out_dim)
    assert var.shape == (ensemble_size, batch, out_dim)
    assert jnp.allclose(mean, ref_mean, atol=2e-2, rtol=2e-2)
    assert jnp.allclose(var, ref_var, atol=2e-2, rtol=2e-2)

    print("KERNEL_OK")
</pallas_src>

<mosaic_0001>
module attributes {stable_mosaic.version = 11 : i64} {
  func.func @_ensemble_forward_kernel(%arg0: i32, %arg1: i32, %arg2: memref<1x8x12xf32, #tpu.memory_space<vmem>>, %arg3: memref<1x12x128xbf16, #tpu.memory_space<vmem>>, %arg4: memref<1x3x128x128xbf16, #tpu.memory_space<vmem>>, %arg5: memref<1x128x256xbf16, #tpu.memory_space<vmem>>, %arg6: memref<1x4x1x128xf32, #tpu.memory_space<vmem>>, %arg7: memref<1x1x256xf32, #tpu.memory_space<vmem>>, %arg8: memref<3x128xf32, #tpu.memory_space<vmem>>, %arg9: memref<1x8x128xf32, #tpu.memory_space<vmem>>, %arg10: memref<1x8x128xf32, #tpu.memory_space<vmem>>) attributes {dimension_semantics = [#tpu.dimension_semantics<parallel>, #tpu.dimension_semantics<parallel>], iteration_bounds = array<i64: 4, 1>, scalar_prefetch = 0 : i64, scratch_operands = 0 : i64, tpu.core_type = #tpu.core_type<tc>, window_params = [{transform_indices = @transform_0, window_bounds = array<i64: 1, 8, 12>}, {transform_indices = @transform_1, window_bounds = array<i64: 1, 12, 128>}, {transform_indices = @transform_2, window_bounds = array<i64: 1, 3, 128, 128>}, {transform_indices = @transform_3, window_bounds = array<i64: 1, 128, 256>}, {transform_indices = @transform_4, window_bounds = array<i64: 1, 4, 1, 128>}, {transform_indices = @transform_5, window_bounds = array<i64: 1, 1, 256>}, {pipeline_mode = #tpu.pipeline_mode<synchronous>, transform_indices = @transform_6, window_bounds = array<i64: 3, 128>}, {transform_indices = @transform_7, window_bounds = array<i64: 1, 8, 128>}, {transform_indices = @transform_8, window_bounds = array<i64: 1, 8, 128>}]} {
    %c0 = arith.constant 0 : index
    %c0_0 = arith.constant 0 : index
    %c0_1 = arith.constant 0 : index
    %0 = vector.load %arg2[%c0, %c0_0, %c0_1] : memref<1x8x12xf32, #tpu.memory_space<vmem>>, vector<1x8x12xf32>
    %1 = vector.shape_cast %0 : vector<1x8x12xf32> to vector<8x12xf32>
    %2 = arith.truncf %1 : vector<8x12xf32> to vector<8x12xbf16>
    %c0_2 = arith.constant 0 : index
    %c0_3 = arith.constant 0 : index
    %c0_4 = arith.constant 0 : index
    %3 = vector.load %arg3[%c0_2, %c0_3, %c0_4] : memref<1x12x128xbf16, #tpu.memory_space<vmem>>, vector<1x12x128xbf16>
    %4 = vector.shape_cast %3 : vector<1x12x128xbf16> to vector<12x128xbf16>
    %cst = arith.constant dense<0.000000e+00> : vector<8x128xf32>
    %5 = tpu.matmul %2, %4, %cst {dimension_numbers = #tpu.dot_dimension_numbers<[1], [0], [0], [1], [0, 0, 1, 1], [], []>} : vector<8x12xbf16>, vector<12x128xbf16>, vector<8x128xf32> -> vector<8x128xf32>
    %c0_5 = arith.constant 0 : index
    %c0_6 = arith.constant 0 : index
    %c0_7 = arith.constant 0 : index
    %c0_8 = arith.constant 0 : index
    %6 = vector.load %arg6[%c0_5, %c0_6, %c0_7, %c0_8] : memref<1x4x1x128xf32, #tpu.memory_space<vmem>>, vector<1x1x1x128xf32>
    %7 = vector.shape_cast %6 : vector<1x1x1x128xf32> to vector<1x128xf32>
    %8 = vector.broadcast %7 : vector<1x128xf32> to vector<8x128xf32>
    %9 = arith.addf %5, %8 : vector<8x128xf32>
    %cst_9 = arith.constant 5.000000e-01 : f32
    %10 = vector.broadcast %cst_9 : f32 to vector<8x128xf32>
    %11 = arith.mulf %10, %9 : vector<8x128xf32>
    %12 = math.tanh %11 : vector<8x128xf32>
    %cst_10 = arith.constant 5.000000e-01 : f32
    %13 = vector.broadcast %cst_10 : f32 to vector<8x128xf32>
    %14 = arith.mulf %13, %12 : vector<8x128xf32>
    %cst_11 = arith.constant 5.000000e-01 : f32
    %15 = vector.broadcast %cst_11 : f32 to vector<8x128xf32>
    %16 = arith.addf %14, %15 : vector<8x128xf32>
    %17 = arith.mulf %9, %16 : vector<8x128xf32>
    %18 = arith.truncf %17 : vector<8x128xf32> to vector<8x128xbf16>
    %c0_12 = arith.constant 0 : index
    %c0_13 = arith.constant 0 : index
    %c0_14 = arith.constant 0 : index
    %c0_15 = arith.constant 0 : index
    %19 = vector.load %arg4[%c0_12, %c0_13, %c0_14, %c0_15] : memref<1x3x128x128xbf16, #tpu.memory_space<vmem>>, vector<1x1x128x128xbf16>
    %20 = vector.shape_cast %19 : vector<1x1x128x128xbf16> to vector<128x128xbf16>
    %cst_16 = arith.constant dense<0.000000e+00> : vector<8x128xf32>
    %21 = tpu.matmul %18, %20, %cst_16 {dimension_numbers = #tpu.dot_dimension_numbers<[1], [0], [0], [1], [0, 0, 1, 1], [], []>} : vector<8x128xbf16>, vector<128x128xbf16>, vector<8x128xf32> -> vector<8x128xf32>
    %c0_17 = arith.constant 0 : index
    %c1 = arith.constant 1 : index
    %c0_18 = arith.constant 0 : index
    %c0_19 = arith.constant 0 : index
    %22 = vector.load %arg6[%c0_17, %c1, %c0_18, %c0_19] : memref<1x4x1x128xf32, #tpu.memory_space<vmem>>, vector<1x1x1x128xf32>
    %23 = vector.shape_cast %22 : vector<1x1x1x128xf32> to vector<1x128xf32>
    %24 = vector.broadcast %23 : vector<1x128xf32> to vector<8x128xf32>
    %25 = arith.addf %21, %24 : vector<8x128xf32>
    %cst_20 = arith.constant 5.000000e-01 : f32
    %26 = vector.broadcast %cst_20 : f32 to vector<8x128xf32>
    %27 = arith.mulf %26, %25 : vector<8x128xf32>
    %28 = math.tanh %27 : vector<8x128xf32>
    %cst_21 = arith.constant 5.000000e-01 : f32
    %29 = vector.broadcast %cst_21 : f32 to vector<8x128xf32>
    %30 = arith.mulf %29, %28 : vector<8x128xf32>
    %cst_22 = arith.constant 5.000000e-01 : f32
    %31 = vector.broadcast %cst_22 : f32 to vector<8x128xf32>
    %32 = arith.addf %30, %31 : vector<8x128xf32>
    %33 = arith.mulf %25, %32 : vector<8x128xf32>
    %34 = arith.truncf %33 : vector<8x128xf32> to vector<8x128xbf16>
    %c0_23 = arith.constant 0 : index
    %c1_24 = arith.constant 1 : index
    %c0_25 = arith.constant 0 : index
    %c0_26 = arith.constant 0 : index
    %35 = vector.load %arg4[%c0_23, %c1_24, %c0_25, %c0_26] : memref<1x3x128x128xbf16, #tpu.memory_space<vmem>>, vector<1x1x128x128xbf16>
    %36 = vector.shape_cast %35 : vector<1x1x128x128xbf16> to vector<128x128xbf16>
    %cst_27 = arith.constant dense<0.000000e+00> : vector<8x128xf32>
    %37 = tpu.matmul %34, %36, %cst_27 {dimension_numbers = #tpu.dot_dimension_numbers<[1], [0], [0], [1], [0, 0, 1, 1], [], []>} : vector<8x128xbf16>, vector<128x128xbf16>, vector<8x128xf32> -> vector<8x128xf32>
    %c0_28 = arith.constant 0 : index
    %c2 = arith.constant 2 : index
    %c0_29 = arith.constant 0 : index
    %c0_30 = arith.constant 0 : index
    %38 = vector.load %arg6[%c0_28, %c2, %c0_29, %c0_30] : memref<1x4x1x128xf32, #tpu.memory_space<vmem>>, vector<1x1x1x128xf32>
    %39 = vector.shape_cast %38 : vector<1x1x1x128xf32> to vector<1x128xf32>
    %40 = vector.broadcast %39 : vector<1x128xf32> to vector<8x128xf32>
    %41 = arith.addf %37, %40 : vector<8x128xf32>
    %cst_31 = arith.constant 5.000000e-01 : f32
    %42 = vector.broadcast %cst_31 : f32 to vector<8x128xf32>
    %43 = arith.mulf %42, %41 : vector<8x128xf32>
    %44 = math.tanh %43 : vector<8x128xf32>
    %cst_32 = arith.constant 5.000000e-01 : f32
    %45 = vector.broadcast %cst_32 : f32 to vector<8x128xf32>
    %46 = arith.mulf %45, %44 : vector<8x128xf32>
    %cst_33 = arith.constant 5.000000e-01 : f32
    %47 = vector.broadcast %cst_33 : f32 to vector<8x128xf32>
    %48 = arith.addf %46, %47 : vector<8x128xf32>
    %49 = arith.mulf %41, %48 : vector<8x128xf32>
    %50 = arith.truncf %49 : vector<8x128xf32> to vector<8x128xbf16>
    %c0_34 = arith.constant 0 : index
    %c2_35 = arith.constant 2 : index
    %c0_36 = arith.constant 0 : index
    %c0_37 = arith.constant 0 : index
    %51 = vector.load %arg4[%c0_34, %c2_35, %c0_36, %c0_37] : memref<1x3x128x128xbf16, #tpu.memory_space<vmem>>, vector<1x1x128x128xbf16>
    %52 = vector.shape_cast %51 : vector<1x1x128x128xbf16> to vector<128x128xbf16>
    %cst_38 = arith.constant dense<0.000000e+00> : vector<8x128xf32>
    %53 = tpu.matmul %50, %52, %cst_38 {dimension_numbers = #tpu.dot_dimension_numbers<[1], [0], [0], [1], [0, 0, 1, 1], [], []>} : vector<8x128xbf16>, vector<128x128xbf16>, vector<8x128xf32> -> vector<8x128xf32>
    %c0_39 = arith.constant 0 : index
    %c3 = arith.constant 3 : index
    %c0_40 = arith.constant 0 : index
    %c0_41 = arith.constant 0 : index
    %54 = vector.load %arg6[%c0_39, %c3, %c0_40, %c0_41] : memref<1x4x1x128xf32, #tpu.memory_space<vmem>>, vector<1x1x1x128xf32>
    %55 = vector.shape_cast %54 : vector<1x1x1x128xf32> to vector<1x128xf32>
    %56 = vector.broadcast %55 : vector<1x128xf32> to vector<8x128xf32>
    %57 = arith.addf %53, %56 : vector<8x128xf32>
    %cst_42 = arith.constant 5.000000e-01 : f32
    %58 = vector.broadcast %cst_42 : f32 to vector<8x128xf32>
    %59 = arith.mulf %58, %57 : vector<8x128xf32>
    %60 = math.tanh %59 : vector<8x128xf32>
    %cst_43 = arith.constant 5.000000e-01 : f32
    %61 = vector.broadcast %cst_43 : f32 to vector<8x128xf32>
    %62 = arith.mulf %61, %60 : vector<8x128xf32>
    %cst_44 = arith.constant 5.000000e-01 : f32
    %63 = vector.broadcast %cst_44 : f32 to vector<8x128xf32>
    %64 = arith.addf %62, %63 : vector<8x128xf32>
    %65 = arith.mulf %57, %64 : vector<8x128xf32>
    %66 = arith.truncf %65 : vector<8x128xf32> to vector<8x128xbf16>
    %c0_45 = arith.constant 0 : index
    %c0_46 = arith.constant 0 : index
    %c0_47 = arith.constant 0 : index
    %67 = vector.load %arg5[%c0_45, %c0_46, %c0_47] : memref<1x128x256xbf16, #tpu.memory_space<vmem>>, vector<1x128x256xbf16>
    %68 = vector.shape_cast %67 : vector<1x128x256xbf16> to vector<128x256xbf16>
    %cst_48 = arith.constant dense<0.000000e+00> : vector<8x256xf32>
    %69 = tpu.matmul %66, %68, %cst_48 {dimension_numbers = #tpu.dot_dimension_numbers<[1], [0], [0], [1], [0, 0, 1, 1], [], []>} : vector<8x128xbf16>, vector<128x256xbf16>, vector<8x256xf32> -> vector<8x256xf32>
    %c0_49 = arith.constant 0 : index
    %c0_50 = arith.constant 0 : index
    %c0_51 = arith.constant 0 : index
    %70 = vector.load %arg7[%c0_49, %c0_50, %c0_51] : memref<1x1x256xf32, #tpu.memory_space<vmem>>, vector<1x1x256xf32>
    %71 = vector.shape_cast %70 : vector<1x1x256xf32> to vector<1x256xf32>
    %72 = vector.broadcast %71 : vector<1x256xf32> to vector<8x256xf32>
    %73 = arith.addf %69, %72 : vector<8x256xf32>
    %74 = vector.extract_strided_slice %73 {offsets = [0, 0], sizes = [8, 128], strides = [1, 1]} : vector<8x256xf32> to vector<8x128xf32>
    %75 = vector.extract_strided_slice %73 {offsets = [0, 128], sizes = [8, 128], strides = [1, 1]} : vector<8x256xf32> to vector<8x128xf32>
    %c0_52 = arith.constant 0 : index
    %c0_53 = arith.constant 0 : index
    %76 = vector.load %arg8[%c0_52, %c0_53] : memref<3x128xf32, #tpu.memory_space<vmem>>, vector<1x128xf32>
    %c1_54 = arith.constant 1 : index
    %c0_55 = arith.constant 0 : index
    %77 = vector.load %arg8[%c1_54, %c0_55] : memref<3x128xf32, #tpu.memory_space<vmem>>, vector<1x128xf32>
    %c2_56 = arith.constant 2 : index
    %c0_57 = arith.constant 0 : index
    %78 = vector.load %arg8[%c2_56, %c0_57] : memref<3x128xf32, #tpu.memory_space<vmem>>, vector<1x128xf32>
    %79 = vector.broadcast %76 : vector<1x128xf32> to vector<8x128xf32>
    %80 = arith.subf %79, %75 : vector<8x128xf32>
    %cst_58 = arith.constant 0.000000e+00 : f32
    %81 = vector.broadcast %cst_58 : f32 to vector<8x128xf32>
    %82 = arith.maximumf %80, %81 : vector<8x128xf32>
    %83 = math.absf %80 : vector<8x128xf32>
    %cst_59 = arith.constant 0.000000e+00 : f32
    %84 = vector.broadcast %cst_59 : f32 to vector<8x128xf32>
    %85 = arith.subf %84, %83 : vector<8x128xf32>
    %86 = math.exp %85 : vector<8x128xf32>
    %87 = math.log1p %86 : vector<8x128xf32>
    %88 = arith.addf %82, %87 : vector<8x128xf32>
    %89 = vector.broadcast %76 : vector<1x128xf32> to vector<8x128xf32>
    %90 = arith.subf %89, %88 : vector<8x128xf32>
    %91 = vector.broadcast %77 : vector<1x128xf32> to vector<8x128xf32>
    %92 = arith.subf %90, %91 : vector<8x128xf32>
    %93 = math.exp %92 : vector<8x128xf32>
    %cst_60 = arith.constant 1.000000e+00 : f32
    %94 = vector.broadcast %cst_60 : f32 to vector<8x128xf32>
    %95 = arith.addf %94, %93 : vector<8x128xf32>
    %96 = vector.broadcast %78 : vector<1x128xf32> to vector<8x128xf32>
    %97 = arith.mulf %96, %95 : vector<8x128xf32>
    %c0_61 = arith.constant 0 : index
    %c0_62 = arith.constant 0 : index
    %c0_63 = arith.constant 0 : index
    %98 = vector.load %arg9[%c0_61, %c0_62, %c0_63] : memref<1x8x128xf32, #tpu.memory_space<vmem>>, vector<1x8x128xf32>
    %99 = vector.shape_cast %98 : vector<1x8x128xf32> to vector<8x128xf32>
    %100 = vector.shape_cast %74 : vector<8x128xf32> to vector<1x8x128xf32>
    tpu.vector_store %arg9[%c0_61, %c0_62, %c0_63], %100 {strides = array<i32>} : memref<1x8x128xf32, #tpu.memory_space<vmem>>, vector<1x8x128xf32>,
    %c0_64 = arith.constant 0 : index
    %c0_65 = arith.constant 0 : index
    %c0_66 = arith.constant 0 : index
    %101 = vector.load %arg10[%c0_64, %c0_65, %c0_66] : memref<1x8x128xf32, #tpu.memory_space<vmem>>, vector<1x8x128xf32>
    %102 = vector.shape_cast %101 : vector<1x8x128xf32> to vector<8x128xf32>
    %103 = vector.shape_cast %97 : vector<8x128xf32> to vector<1x8x128xf32>
    tpu.vector_store %arg10[%c0_64, %c0_65, %c0_66], %103 {strides = array<i32>} : memref<1x8x128xf32, #tpu.memory_space<vmem>>, vector<1x8x128xf32>,
    return
  }
  func.func @transform_0(%arg0: i32, %arg1: i32) -> (i32, i32, i32) {
    %c0_i32 = arith.constant 0 : i32
    %c0_i32_0 = arith.constant 0 : i32
    return %arg0, %arg1, %c0_i32 : i32, i32, i32
  }
  func.func @transform_1(%arg0: i32, %arg1: i32) -> (i32, i32, i32) {
    %c0_i32 = arith.constant 0 : i32
    %c0_i32_0 = arith.constant 0 : i32
    %c0_i32_1 = arith.constant 0 : i32
    return %arg0, %c0_i32, %c0_i32_0 : i32, i32, i32
  }
  func.func @transform_2(%arg0: i32, %arg1: i32) -> (i32, i32, i32, i32) {
    %c0_i32 = arith.constant 0 : i32
    %c0_i32_0 = arith.constant 0 : i32
    %c0_i32_1 = arith.constant 0 : i32
    %c0_i32_2 = arith.constant 0 : i32
    return %arg0, %c0_i32, %c0_i32_0, %c0_i32_1 : i32, i32, i32, i32
  }
  func.func @transform_3(%arg0: i32, %arg1: i32) -> (i32, i32, i32) {
    %c0_i32 = arith.constant 0 : i32
    %c0_i32_0 = arith.constant 0 : i32
    %c0_i32_1 = arith.constant 0 : i32
    return %arg0, %c0_i32, %c0_i32_0 : i32, i32, i32
  }
  func.func @transform_4(%arg0: i32, %arg1: i32) -> (i32, i32, i32, i32) {
    %c0_i32 = arith.constant 0 : i32
    %c0_i32_0 = arith.constant 0 : i32
    %c0_i32_1 = arith.constant 0 : i32
    %c0_i32_2 = arith.constant 0 : i32
    return %arg0, %c0_i32, %c0_i32_0, %c0_i32_1 : i32, i32, i32, i32
  }
  func.func @transform_5(%arg0: i32, %arg1: i32) -> (i32, i32, i32) {
    %c0_i32 = arith.constant 0 : i32
    %c0_i32_0 = arith.constant 0 : i32
    %c0_i32_1 = arith.constant 0 : i32
    return %arg0, %c0_i32, %c0_i32_0 : i32, i32, i32
  }
  func.func @transform_6(%arg0: i32, %arg1: i32) -> (i32, i32) {
    %c0_i32 = arith.constant 0 : i32
    %c0_i32_0 = arith.constant 0 : i32
    %c0_i32_1 = arith.constant 0 : i32
    return %c0_i32, %c0_i32_0 : i32, i32
  }
  func.func @transform_7(%arg0: i32, %arg1: i32) -> (i32, i32, i32) {
    %c0_i32 = arith.constant 0 : i32
    %c0_i32_0 = arith.constant 0 : i32
    return %arg0, %arg1, %c0_i32 : i32, i32, i32
  }
  func.func @transform_8(%arg0: i32, %arg1: i32) -> (i32, i32, i32) {
    %c0_i32 = arith.constant 0 : i32
    %c0_i32_0 = arith.constant 0 : i32
    return %arg0, %arg1, %c0_i32 : i32, i32, i32
  }
}

</mosaic_0001>

<bundles_post_ra>
// kernel: tpu_custom_call.1
= control target key start
LH: loop header
LB: loop body
LE: loop exit
PB: predicated region body
PF: predicated region fallthrough
CT: control target
= control target key end

     0   :  { %s2263_s0 = inlined_call_operand.vmem [shape: f32[4,8,12], index: 0, kind: input, shape index: {}]   ;;  %s2264_s1 = inlined_call_operand.vmem [shape: bf16[4,12,128], index: 1, kind: input, shape index: {}]   ;;  %s2265_s2 = inlined_call_operand.hbm [shape: bf16[4,3,128,128], index: 2, kind: input, shape index: {}]   ;;  %s2266_s3 = inlined_call_operand.hbm [shape: bf16[4,128,256], index: 3, kind: input, shape index: {}]   ;;  %s2267_s4 = inlined_call_operand.vmem [shape: f32[4,4,1,128], index: 4, kind: input, shape index: {}]   ;;  %s2268_s5 = inlined_call_operand.vmem [shape: f32[4,1,256], index: 5, kind: input, shape index: {}]   ;;  %s2269_s6 = inlined_call_operand.vmem [shape: f32[3,128], index: 6, kind: input, shape index: {}]   ;;  %s2270_s7 = inlined_call_operand.hbm [shape: f32[4,8,128], index: 7, kind: output, shape index: {0}]   ;;  %s2271_s8 = inlined_call_operand.hbm [shape: f32[4,8,128], index: 8, kind: output, shape index: {1}]  }
   0x1   :  { %2276 = sst [smem:[#allocation17_spill]] %s2265_s2 }
   0x2   :  { %14 = vsyncpa [#allocation3], 0 }
   0x3   :  { %16 = vsyncpa [#allocation3 + $0x1], 0 }
   0x4   :  { %17 = vsyncpa [#allocation6], 0 }
   0x5   :  { %19 = vsyncpa [#allocation6 + $0x1], 0 }
   0x6   :  { %20 = vsyncpa [#allocation4], 0 }
   0x7   :  { %22 = vsyncpa [#allocation4 + $0x1], 0 }
   0x8   :  { %23 = vsyncpa [#allocation9], 0 }
   0x9   :  { %25 = vsyncpa [#allocation9 + $0x1], 0  ;;  %s1893_s27 = smov 0   ;;  %s1895_s28 = smov 0  }
   0xa   :  { %s1897_s29 = smov 0   ;;  %s1899_s30 = smov 0  }
   0xb   :  { %s1901_s9 = smov 0   ;;  %s1903_s10 = smov 0  }
   0xc LB: > { %2277 = sst [smem:[#allocation14_spill]] %s1823_s29  ;;  %s1308_s11 = sadd.s32 4294967295, %s1835_s10   ;;  %s1835_s10 = sphi %s1903_s10, %s31_s10   ;;  %s1831_s9 = sphi %s1901_s9, %s2297_s9   ;;  %s1827_s30 = sphi %s1899_s30, %s2296_s30   ;;  %s1823_s29 = sphi %s1897_s29, %s2292_s29   ;;  %s1819_s28 = sphi %s1895_s28, %s2295_s28   ;;  %s1815_s27 = sphi %s1893_s27, %s2294_s27  }
   0xd   : > { %s1309_s12 = sadd.s32 4294967294, %s1835_s10   ;;  %s43_s13 = sadd.s32 1, %s1831_s9 }
   0xe   : > { %s104_s14 = sadd.s32 1, %s1823_s29  ;;  %p45_p0 = scmp.ge.s32.totalorder %s43_s13, 4 }
   0xf   : > { %p111_p1 = scmp.ne.s32.totalorder %s1823_s29, %s1819_s28  ;;  %p112_p2 = scmp.eq.s32.totalorder %s1835_s10, 0 }
  0x10   : > { %p117_p3 = scmp.ne.s32.totalorder %s1819_s28, %s1815_s27  ;;  %s2299_s13 = smov (%p45_p0, %s43_s13), 0 }
  0x11   : > { %2278 = sst [smem:[#allocation15_spill]] %s2299_s13  ;;  %p1934_p4 = por %p112_p2, %p111_p1 }
  0x12   : > { %p118_p5 = scmp.eq.s32.totalorder %s1308_s11, 0  ;;  %s101_s16 = ssub.s32 %s1831_s9, %s2299_s13 }
  0x13   : > { %p242_p6 = scmp.eq.s32.totalorder %s1308_s11, 3  ;;  %p102_p7 = scmp.eq.s32.totalorder %s101_s16, 0 }
  0x14   : > { %p1940_p8 = por %p118_p5, %p117_p3  ;;  %p248_p10 = scmp.eq.s32.totalorder %s1309_s12, 3 }
  0x15   : > { %p1944_p9 = por %p242_p6, %p111_p1  ;;  %p1537_p12 = scmp.lt.s32.totalorder %s1835_s10, 4 }
  0x16   : > { %s2280_s17 = scalar_select %p1940_p8, 1, 0 }
  0x17   : > { %s2281_s18 = scalar_select %p1944_p9, 1, 0 }
  0x18   : > { %s1949_s19 = scalar_select %p102_p7, %s1823_s29, %s104_s14  }
  0x19   : > { %p1951_p11 = por %p248_p10, %p117_p3  ;;  %s1957_s21 = sand.u32 1, %s1823_s29  }
  0x1a   : > { %2282 = sst [smem:[#allocation16_spill]] %s1949_s19  ;;  %s1512_s22 = smul.u32 192, %s1957_s21 }
  0x1b   : > { %s2283_s20 = scalar_select %p1951_p11, 1, 0 }
  0x1c   : > { %s1513_s23 = smul.u32 3072, %s1831_s9  ;;  %p1963_p13 = pnand %p1537_p12, %p1934_p4 }
  0x1d   : > { %s2285_s2 = sld [smem:[#allocation17_spill]]  ;;  %s321_s12 = scalar_lea.vmem [#allocation2], %s1512_s22 }
  0x1e   : > { %s328_s14 = sshll.u32 %s321_s12, 4  ;;  %s318_s15 = scalar_lea.sflag [#allocation3], %s1957_s21  ;;  %s1972_s14 = int_to_ptr.vmem [resolvable:$true] %s328_s14 }
  0x1f   : > { %p1659_p2 = pneg %p1963_p13 }
  0x23   : > { %s1970_s11 = scalar_lea.hbm %s2285_s2, %s1513_s23  ;;  %s1662_s26 = scalar_lea.hbm %s2285_s2, 12288 }
  0x24   : > { %s1657_s16 = scalar_lea.hbm %s1970_s11, 3072  ;;  %p1663_p5 = scmp.lt.u32.totalorder %s1970_s11, %s2285_s2 }
  0x25   : > { %p1658_p1 = scmp.ne.s32.totalorder %s1970_s11, %s1657_s16  ;;  %p1664_p6 = scmp.lt.u32.totalorder %s1662_s26, %s1657_s16 }
  0x26   : > { %p1666_p10 = scmp.lt.u32.totalorder %s1657_s16, %s1970_s11 }
  0x27   : > { %p1660_p3 = pnand %p1659_p2, %p1658_p1  ;;  %p1665_p7 = por %p1664_p6, %p1663_p5 }
  0x29   : > { %p1661_p4 = pneg %p1660_p3  ;;  %p1667_p12 = por %p1666_p10, %p1665_p7 }
  0x2b   : > { %p1668_p0 = pnand %p1667_p12, %p1661_p4 }
  0x2d   : > { %1671 = shalt.err (!%p1668_p0)
}
  0x2e   : > { %s1672_s22 = scalar_lea.vmem %s1972_s14, 3072  ;;  %s1837_s12 = smov [#allocation2]  }
  0x2f   : > { %p1673_p1 = scmp.ne.s32.totalorder %s1972_s14, %s1672_s22  ;;  %s1677_s23 = sshll.u32 %s1837_s12, 4  ;;  %s1678_s23 = int_to_ptr.vmem [resolvable:$false] %s1677_s23 }
  0x30   : > { %s1679_s13 = scalar_lea.vmem %s1678_s23, 6144  ;;  %p1680_p9 = scmp.lt.s32.totalorder %s1972_s14, %s1678_s23 }
  0x31   : > { %p1675_p3 = pnand %p1673_p1, %p1659_p2  ;;  %p1681_p5 = scmp.lt.s32.totalorder %s1679_s13, %s1672_s22 }
  0x33   : > { %p1676_p11 = pneg %p1675_p3  ;;  %p1682_p6 = por %p1681_p5, %p1680_p9 }
  0x35   : > { %p1683_p7 = pnand %p1682_p6, %p1676_p11 }
  0x37   : > { %1686 = shalt.err (!%p1683_p7)
}
  0x38   : > { %s1838_s19 = smov 64   ;;  %s1839_s16 = smov 4  }
  0x39   : > { %1526 = dma.hbm_to_vmem [thread:$0]  (!%p1963_p13), %s1970_s11, 3072, %s1972_s14, %s318_s15, %s1838_s19, %s1838_s19, %s1839_s16  }
  0x3a   : > { %p371_p0 = scmp.lt.s32.totalorder %s1835_s10, 5  ;;  %s1313_s25 = sshll.u32 %s1957_s21, 7 }
  0x3b   : > { %s1415_s26 = sshll.u32 %s1831_s9, 11  ;;  %p2286_p9 = scmp.ge.s32.totalorder %s1835_s10, 1 }
  0x3c   : > { %s2015_s13 = scalar_lea.hbm %s2266_s3, %s1415_s26  ;;  %s342_s2 = scalar_lea.vmem [#allocation5], %s1313_s25 }
  0x3d   : > { %p2008_p11 = pnand %p2286_p9, %p371_p0  ;;  %s349_s29 = sshll.u32 %s342_s2, 4  ;;  %s2017_s29 = int_to_ptr.vmem [resolvable:$true] %s349_s29 }
  0x3e   : > { %s339_s11 = scalar_lea.sflag [#allocation6], %s1957_s21  ;;  %s1687_s14 = scalar_lea.hbm %s2015_s13, 2048 }
  0x3f   : > { %p1688_p4 = scmp.ne.s32.totalorder %s2015_s13, %s1687_s14  ;;  %s1692_s16 = scalar_lea.hbm %s2266_s3, 8192 }
  0x40   : > { %p1693_p1 = scmp.lt.u32.totalorder %s2015_s13, %s2266_s3  ;;  %p1694_p3 = scmp.lt.u32.totalorder %s1692_s16, %s1687_s14 }
  0x41   : > { %p1690_p10 = pnand %p1688_p4, %p1659_p2  ;;  %p1696_p6 = scmp.lt.u32.totalorder %s1687_s14, %s2015_s13 }
  0x42   : > { %p1695_p5 = por %p1694_p3, %p1693_p1 }
  0x43   : > { %p1691_p12 = pneg %p1690_p10 }
  0x44   : > { %p1697_p7 = por %p1696_p6, %p1695_p5 }
  0x46   : > { %p1698_p0 = pnand %p1697_p7, %p1691_p12 }
  0x48   : > { %1701 = shalt.err (!%p1698_p0)
}
  0x49   : > { %s1702_s2 = scalar_lea.vmem %s2017_s29, 2048  ;;  %s1840_s25 = smov [#allocation5]  }
  0x4a   : > { %p1703_p9 = scmp.ne.s32.totalorder %s2017_s29, %s1702_s2  ;;  %s1707_s23 = sshll.u32 %s1840_s25, 4  ;;  %s1708_s23 = int_to_ptr.vmem [resolvable:$false] %s1707_s23 }
  0x4b   : > { %s1709_s15 = scalar_lea.vmem %s1708_s23, 4096  ;;  %p1710_p8 = scmp.lt.s32.totalorder %s2017_s29, %s1708_s23 }
  0x4c   : > { %p1705_p4 = pnand %p1703_p9, %p1659_p2  ;;  %p1711_p1 = scmp.lt.s32.totalorder %s1709_s15, %s1702_s2 }
  0x4e   : > { %p1706_p10 = pneg %p1705_p4  ;;  %p1712_p3 = por %p1711_p1, %p1710_p8 }
  0x50   : > { %p1713_p5 = pnand %p1712_p3, %p1706_p10 }
  0x52   : > { %1716 = shalt.err (!%p1713_p5)
}
  0x53   : > { %s1841_s14 = smov 128   ;;  %s1842_s19 = smov 8  }
  0x54   : > { %1529 = dma.hbm_to_vmem [thread:$0]  (!%p1963_p13), %s2015_s13, 2048, %s2017_s29, %s339_s11, %s1841_s14, %s1841_s14, %s1842_s19  }
  0x55   : > { %375 = sbr.rel (%p2008_p11) target bundleno = 1346 (0x542), region = 48  ;;  %s2048_s16 = sand.u32 (!%p2008_p11), 1, %s1819_s28  }
  0x56   : > { %s1514_s26 = smul.u32 (!%p2008_p11), 192, %s2048_s16  ;;  %s378_s12 = scalar_lea.sflag (!%p2008_p11), [#allocation3], %s2048_s16 }
  0x57   : > { %p2288_p8 = scmp.ne.s32.totalorder (!%p2008_p11), %s2280_s17, 0 }
  0x58   : > { %s2052_s2 = scalar_lea.vmem (!%p2008_p11), [#allocation2], %s1514_s26 }
  0x5c   : > { %1798 = dma.done.wait (%p2288_p8), %s378_s12, 3072  }
  0x5d   : > { %1800 = vsyncadd (%p2288_p8), %s378_s12, 4294964224  ;;  %s1317_s29 = sshll.u32 %s2048_s16, 7  ;;  %s387_s21 = scalar_lea.sflag [#allocation6], %s2048_s16 }
  0x5e   : > { %s2060_s24 = scalar_lea.vmem [#allocation5], %s1317_s29 }
  0x5f   : > { %1802 = dma.done.wait (%p2288_p8), %s387_s21, 2048  }
  0x60   : > { %1804 = vsyncadd (%p2288_p8), %s387_s21, 4294965248  ;;  %p453_p13 = scmp.lt.s32.totalorder %s1827_s30, 3  ;;  %v1843_v0 = vmov 0.0   ;;  %vm1844_vm0 = vmmov 0   ;;  %vm494_vm1 = vcmask 1045504   ;;  %v1595_v3 = vld [vmem:[%s2052_s2] sm:$0xff]  }
  0x61   : > { %1446 = vmatprep.subr.bf16.mxu0 %v1843_v0  ;;  %1448 = vmatprep.mubr.msk.bf16.mxu0 %vm1844_vm0, %v1843_v0  ;;  %vm490_vm2 = vcmask 97280   ;;  %v1596_v6 = vld [vmem:[%s2052_s2 + $0x8] sm:$0xff]   ;;  %v1597_v7 = vld [vmem:[%s2052_s2 + $0x10] sm:$0xff]   ;;  %v1598_v8 = vld [vmem:[%s2052_s2 + $0x18] sm:$0xff]   ;;  %s1318_s13 = sshll.u32 %s2048_s16, 3  ;;  %s1411_s11 = sshll.u32 %s1827_s30, 7 }
  0x62   : > { %s2071_s22 = scalar_select %p453_p13, %s1827_s30, 3  ;;  %1452 = vmatprep.subr.bf16.mxu1 %v1843_v0  ;;  %1468 = vmatprep.mubr.msk.bf16.mxu1 %vm1844_vm0, %v1843_v0  ;;  %v1599_v9 = vld [vmem:[%s2052_s2 + $0x20] sm:$0xff]   ;;  %v1600_v10 = vld [vmem:[%s2052_s2 + $0x28] sm:$0xff]   ;;  %v1601_v11 = vld [vmem:[%s2052_s2 + $0x30] sm:$0xff]  }
  0x63   : > { %1453 = vmatpush3.bf16.msra.mxu1 %v1595_v3  ;;  %v1602_v12 = vld [vmem:[%s2052_s2 + $0x38] sm:$0xff]   ;;  %v1603_v13 = vld [vmem:[%s2052_s2 + $0x40] sm:$0xff]   ;;  %v1604_v14 = vld [vmem:[%s2052_s2 + $0x48] sm:$0xff]   ;;  %s2176_s26 = scalar_lea.hbm %s2270_s7, %s1411_s11  ;;  %s1089_s12 = scalar_lea.sflag [#allocation4], %s2048_s16 }
  0x64   : > { %s1320_s17 = sshll.u32 %s2071_s22, 3  ;;  %1454 = vmatprep.subr.bf16.mxu1 %v1843_v0  ;;  %s1323_s19 = sshll.u32 %s2071_s22, 2  ;;  %v1605_v27 = vld [vmem:[%s2052_s2 + $0x50] sm:$0xff]   ;;  %v1606_v28 = vld [vmem:[%s2052_s2 + $0x58] sm:$0xff]   ;;  %v1607_v29 = vld [vmem:[%s2052_s2 + $0x60] sm:$0xff]  }
  0x65   : > { %s459_s25 = scalar_lea.vmem %s2263_s0, %s1320_s17  ;;  %s464_s14 = scalar_lea.vmem %s2264_s1, %s1320_s17  ;;  %v1608_v30 = vld [vmem:[%s2052_s2 + $0x68] sm:$0xff]   ;;  %v1609_v31 = vld [vmem:[%s2052_s2 + $0x70] sm:$0xff]   ;;  %v1610_v32 = vld [vmem:[%s2052_s2 + $0x78] sm:$0xff]  }
  0x66   : > { %v474_v1 = vld [vmem:[%s459_s25] sm:$0xff]  ;;  %s2110_s29 = scalar_lea.vmem %s2267_s4, %s1323_s19  ;;  %v1612_v34 = vld [vmem:[%s2052_s2 + $0x88] sm:$0xff]   ;;  %v1613_v47 = vld [vmem:[%s2052_s2 + $0x90] sm:$0xff]   ;;  %s445_s25 = scalar_lea.vmem [#allocation7], %s1318_s13 }
  0x67   : > { %v1594_v2 = vld [vmem:[%s464_s14] sm:$0x3f]   ;;  %v475_v5 = vpack.c.bf16 %v474_v1, %v474_v1  ;;  %1455 = vmatpush3.bf16.msra.mxu1 %v1596_v6  ;;  %v1614_v48 = vld [vmem:[%s2052_s2 + $0x98] sm:$0xff]   ;;  %v1616_v50 = vld [vmem:[%s2052_s2 + $0xa8] sm:$0xff]   ;;  %s1108_s23 = sshll.u32 %s445_s25, 4  ;;  %p2289_p11 = scmp.ne.s32.totalorder %s2281_s18, 0  ;;  %s2178_s23 = int_to_ptr.vmem [resolvable:$true] %s1108_s23 }
  0x68   : > { %v496_v4 = vsel %vm494_vm1, %v1594_v2, 0  ;;  %1456 = vmatprep.subr.bf16.mxu1 %v1843_v0  ;;  %v1325_v15 = vld [vmem:[%s2110_s29] ss:$0 sm:$0xff]  ;;  %v1329_v35 = vld [vmem:[%s2110_s29 + $0x1] ss:$0 sm:$0xff]  ;;  %v1617_v51 = vld [vmem:[%s2052_s2 + $0xb0] sm:$0xff]  }
  0x69   : > { %1447 = vmatpush3.bf16.msra.mxu0 %v496_v4  ;;  %v1611_v33 = vld [vmem:[%s2052_s2 + $0x80] sm:$0xff]   ;;  %v1618_v52 = vld [vmem:[%s2052_s2 + $0xb8] sm:$0xff]  }
  0x6a   : > { %1472 = vmatprep.subr.bf16.mxu0 %v1843_v0  ;;  %v1615_v49 = vld [vmem:[%s2052_s2 + $0xa0] sm:$0xff]   ;;  %v1624_v55 = vld [vmem:[%s2060_s24 + $0x14] ss:$8 sps:$4 sm:$0xff]   ;;  %v1622_v56 = vld [vmem:[%s2060_s24 + $0x10] ss:$8 sps:$4 sm:$0xff]   ;;  %s1324_s2 = sshll.u32 %s2071_s22, 1 }
  0x6b   : > { %1457 = vmatpush3.bf16.msra.mxu1 %v1597_v7  ;;  %v1619_v53 = vld [vmem:[%s2060_s24] ss:$8 sps:$4 sm:$0xff]   ;;  %v1621_v54 = vld [vmem:[%s2060_s24 + $0x4] ss:$8 sps:$4 sm:$0xff]   ;;  %v1630_v7 = vld [vmem:[%s2060_s24 + $0x34] ss:$8 sps:$4 sm:$0xff]   ;;  %s472_s17 = scalar_lea.vmem %s2268_s5, %s1324_s2 }
  0x6c   : > { %1449 = vmatmul.mubr.msk.bf16.vlgmr.msra.gmra.mrb[0].mxu0 %vm490_vm2, %v475_v5  ;;  %1458 = vmatprep.subr.bf16.mxu1 %v1843_v0  ;;  %v1355_v57 = vld [vmem:[%s2110_s29 + $0x2] ss:$0 sm:$0xff]  ;;  %v1627_v5 = vld [vmem:[%s2060_s24 + $0x24] ss:$8 sps:$4 sm:$0xff]   ;;  %s1846_s2 = smov [#allocation7]  }
  0x6d   : > { %1488 = vmatprep.mubr.msk.bf16.mxu0 %vm1844_vm0, %v1843_v0  ;;  %1473 = vmatpush3.bf16.msra.mxu0 %v1603_v13  ;;  %v1625_v6 = vld [vmem:[%s2060_s24 + $0x20] ss:$8 sps:$4 sm:$0xff]   ;;  %v1639_v13 = vld [vmem:[%s2060_s24 + $0x64] ss:$8 sps:$4 sm:$0xff]   ;;  %s1721_s21 = sshll.u32 %s1846_s2, 4  ;;  %s1722_s21 = int_to_ptr.vmem [resolvable:$false] %s1721_s21 }
  0x6e   : > { %1474 = vmatprep.subr.bf16.mxu0 %v1843_v0  ;;  %p1724_p7 = scmp.lt.s32.totalorder %s2178_s23, %s1722_s21 }
  0x6f   : > { %1459 = vmatpush3.bf16.msra.mxu1 %v1598_v8  ;;  %v1628_v8 = vld [vmem:[%s2060_s24 + $0x30] ss:$8 sps:$4 sm:$0xff]  }
  0x70   : > { %1460 = vmatprep.subr.bf16.mxu1 %v1843_v0 }
  0x71   : > { %1475 = vmatpush3.bf16.msra.mxu0 %v1604_v14  ;;  %v1637_v14 = vld [vmem:[%s2060_s24 + $0x60] ss:$8 sps:$4 sm:$0xff]  }
  0x72   : > { %1476 = vmatprep.subr.bf16.mxu0 %v1843_v0 }
  0x73   : > { %1461 = vmatpush3.bf16.msra.mxu1 %v1599_v9  ;;  %v1633_v9 = vld [vmem:[%s2060_s24 + $0x44] ss:$8 sps:$4 sm:$0xff]  }
  0x74   : > { %1462 = vmatprep.subr.bf16.mxu1 %v1843_v0 }
  0x75   : > { %1477 = vmatpush3.bf16.msra.mxu0 %v1605_v27 }
  0x76   : > { %1478 = vmatprep.subr.bf16.mxu0 %v1843_v0 }
  0x77   : > { %1463 = vmatpush3.bf16.msra.mxu1 %v1600_v10  ;;  %v1631_v10 = vld [vmem:[%s2060_s24 + $0x40] ss:$8 sps:$4 sm:$0xff]  }
  0x78   : > { %1464 = vmatprep.subr.bf16.mxu1 %v1843_v0 }
  0x79   : > { %1479 = vmatpush3.bf16.msra.mxu0 %v1606_v28 }
  0x7a   : > { %1480 = vmatprep.subr.bf16.mxu0 %v1843_v0 }
  0x7b   : > { %1465 = vmatpush3.bf16.msra.mxu1 %v1601_v11  ;;  %v1636_v11 = vld [vmem:[%s2060_s24 + $0x54] ss:$8 sps:$4 sm:$0xff]  }
  0x7c   : > { %1466 = vmatprep.subr.bf16.mxu1 %v1843_v0 }
  0x7d   : > { %1481 = vmatpush3.bf16.msra.mxu0 %v1607_v29 }
  0x7e   : > { %1482 = vmatprep.subr.bf16.mxu0 %v1843_v0 }
  0x7f   : > { %1467 = vmatpush3.bf16.msra.mxu1 %v1602_v12  ;;  %v1634_v12 = vld [vmem:[%s2060_s24 + $0x50] ss:$8 sps:$4 sm:$0xff]  }
  0x80   : > { %1492 = vmatprep.subr.bf16.mxu1 %v1843_v0 }
  0x81   : > { %1483 = vmatpush3.bf16.msra.mxu0 %v1608_v30  ;;  %v918_v30 = vlaneseq }
  0x82   : > { %1484 = vmatprep.subr.bf16.mxu0 %v1843_v0 }
  0x85   : > { %1485 = vmatpush3.bf16.msra.mxu0 %v1609_v31  ;;  %v919_v31 = vshrl.u32 %v918_v30, 7 }
  0x86   : > { %1486 = vmatprep.subr.bf16.mxu0 %v1843_v0 }
  0x89   : > { %1487 = vmatpush3.bf16.msra.mxu0 %v1610_v32  ;;  %v920_v32 = vsub.s32 0, %v919_v31 }
  0x8a   : > { %1008 = vmatprep.subr.bf16.mxu0 %v1621_v54 }
 0x13f   : > { %v532_v16 = vpop.f32.mrb[0].mxu0 }
 0x140   : > { %v533_v17 = vadd.f32 %v1325_v15, %v532_v16  ;;  %v1450_v18 = vpop.f32.mrb[1].mxu0  ;;  %v1642_v15 = vld [vmem:[%s2060_s24 + $0x74] ss:$8 sps:$4 sm:$0xff]   ;;  %v1640_v16 = vld [vmem:[%s2060_s24 + $0x70] ss:$8 sps:$4 sm:$0xff]   ;;  %s1723_s24 = scalar_lea.vmem %s1722_s21, 256 }
 0x141   : > { %v535_v19 = vpop.f32.mrb[2].mxu0  ;;  %v1381_v18 = vld [vmem:[%s2110_s29 + $0x3] ss:$0 sm:$0xff]  ;;  %s1717_s29 = scalar_lea.vmem %s2178_s23, 128 }
 0x142   : > { %v538_v20 = vmul.f32 0.5, %v533_v17  ;;  %v1451_v21 = vpop.f32.mrb[3].mxu0  ;;  %p1718_p2 = scmp.ne.s32.totalorder %s2178_s23, %s1717_s29  ;;  %p1725_p0 = scmp.lt.s32.totalorder %s1723_s24, %s1717_s29 }
 0x144   : > { %1643 = vtanh.f32 %v538_v20  ;;  %p1719_p12 = pnand %p1718_p2, %p2289_p11  ;;  %p1726_p9 = por %p1725_p0, %p1724_p7 }
 0x146   : > { %p1720_p6 = pneg %p1719_p12 }
 0x148   : > { %p1727_p4 = pnand %p1726_p9, %p1720_p6 }
 0x14e   : > { %v1644_v22 = vpop.eup %1643 }
 0x14f   : > { %v540_v23 = vmul.f32 0.5, %v1644_v22 }
 0x151   : > { %v541_v24 = vadd.f32 0.5, %v540_v23 }
 0x153   : > { %v542_v25 = vmul.f32 %v541_v24, %v533_v17  ;;  %v1845_v17 = vmov 0  }
 0x155   : > { %v543_v26 = vpack.c.bf16 %v542_v25, %v542_v25 }
 0x157   : > { %1469 = vmatmul.mubr.bf16.vlgmr.msra.gmra.mrb[0].mxu1 %v543_v26 }
 0x158   : > { %1508 = vmatprep.mubr.msk.bf16.mxu1 %vm1844_vm0, %v1843_v0  ;;  %1493 = vmatpush3.bf16.msra.mxu1 %v1611_v33  ;;  %v916_v33 = vld [vmem:[%s472_s17] sm:$0x3] }
 0x159   : > { %1494 = vmatprep.subr.bf16.mxu1 %v1843_v0 }
 0x15c   : > { %1495 = vmatpush3.bf16.msra.mxu1 %v1612_v34  ;;  %v924_v34 = vsub.s32 1, %v919_v31 }
 0x15d   : > { %1496 = vmatprep.subr.bf16.mxu1 %v1843_v0 }
 0x160   : > { %1497 = vmatpush3.bf16.msra.mxu1 %v1613_v47 }
 0x161   : > { %1498 = vmatprep.subr.bf16.mxu1 %v1843_v0 }
 0x164   : > { %1499 = vmatpush3.bf16.msra.mxu1 %v1614_v48 }
 0x165   : > { %1500 = vmatprep.subr.bf16.mxu1 %v1843_v0 }
 0x168   : > { %1501 = vmatpush3.bf16.msra.mxu1 %v1615_v49 }
 0x169   : > { %1502 = vmatprep.subr.bf16.mxu1 %v1843_v0 }
 0x16c   : > { %1503 = vmatpush3.bf16.msra.mxu1 %v1616_v50 }
 0x16d   : > { %1504 = vmatprep.subr.bf16.mxu1 %v1843_v0 }
 0x170   : > { %1505 = vmatpush3.bf16.msra.mxu1 %v1617_v51 }
 0x171   : > { %1506 = vmatprep.subr.bf16.mxu1 %v1843_v0 }
 0x174   : > { %1507 = vmatpush3.bf16.msra.mxu1 %v1618_v52 }
 0x22a   : > { %v650_v36 = vpop.f32.mrb[0].mxu1 }
 0x22b   : > { %v651_v37 = vadd.f32 %v1329_v35, %v650_v36  ;;  %v1470_v38 = vpop.f32.mrb[1].mxu1  ;;  %v921_v35 = vrot.slane %v916_v33, %v920_v32  ;;  %v925_v36 = vrot.slane %v916_v33, %v924_v34 }
 0x22c   : > { %v653_v39 = vpop.f32.mrb[2].mxu1 }
 0x22d   : > { %v656_v40 = vmul.f32 0.5, %v651_v37  ;;  %v1471_v41 = vpop.f32.mrb[3].mxu1 }
 0x22f   : > { %1645 = vtanh.f32 %v656_v40  ;;  %v1406_v40 = vld [vmem:[%s2269_s6] ss:$0 sm:$0xff] }
 0x239   : > { %v1646_v42 = vpop.eup %1645 }
 0x23a   : > { %v658_v43 = vmul.f32 0.5, %v1646_v42 }
 0x23c   : > { %v659_v44 = vadd.f32 0.5, %v658_v43 }
 0x23e   : > { %v660_v45 = vmul.f32 %v659_v44, %v651_v37 }
 0x240   : > { %v661_v46 = vpack.c.bf16 %v660_v45, %v660_v45 }
 0x242   : > { %1489 = vmatmul.mubr.bf16.vlgmr.msra.gmra.mrb[4].mxu0 %v661_v46 }
 0x243   : > { %1009 = vmatpush1.bf16.msra.mxu0 %v1619_v53  ;;  %1040 = vmatprep.mubr.bf16.mxu0 %v1845_v17 }
 0x244   : > { %1010 = vmatprep.subr.bf16.mxu0 %v1624_v55 }
 0x247   : > { %1011 = vmatpush1.bf16.msra.mxu0 %v1622_v56 }
 0x248   : > { %1012 = vmatprep.subr.bf16.mxu0 %v1627_v5 }
 0x24b   : > { %1013 = vmatpush1.bf16.msra.mxu0 %v1625_v6 }
 0x24c   : > { %1014 = vmatprep.subr.bf16.mxu0 %v1630_v7 }
 0x24f   : > { %1015 = vmatpush1.bf16.msra.mxu0 %v1628_v8 }
 0x250   : > { %1016 = vmatprep.subr.bf16.mxu0 %v1633_v9 }
 0x253   : > { %1017 = vmatpush1.bf16.msra.mxu0 %v1631_v10 }
 0x254   : > { %1018 = vmatprep.subr.bf16.mxu0 %v1636_v11 }
 0x257   : > { %1019 = vmatpush1.bf16.msra.mxu0 %v1634_v12 }
 0x258   : > { %1020 = vmatprep.subr.bf16.mxu0 %v1639_v13 }
 0x25b   : > { %1021 = vmatpush1.bf16.msra.mxu0 %v1637_v14 }
 0x25c   : > { %1022 = vmatprep.subr.bf16.mxu0 %v1642_v15 }
 0x25f   : > { %1023 = vmatpush1.bf16.msra.mxu0 %v1640_v16 }
 0x315   : > { %v769_v58 = vpop.f32.mrb[4].mxu0 }
 0x316   : > { %v770_v59 = vadd.f32 %v1355_v57, %v769_v58  ;;  %v1490_v60 = vpop.f32.mrb[5].mxu0 }
 0x317   : > { %v772_v61 = vpop.f32.mrb[6].mxu0 }
 0x318   : > { %v775_v62 = vmul.f32 0.5, %v770_v59  ;;  %v1491_v63 = vpop.f32.mrb[7].mxu0 }
 0x31a   : > { %1647 = vtanh.f32 %v775_v62 }
 0x324   : > { %v1648_v0 = vpop.eup %1647 }
 0x325   : > { %v777_v1 = vmul.f32 0.5, %v1648_v0 }
 0x327   : > { %v778_v2 = vadd.f32 0.5, %v777_v1 }
 0x329   : > { %v779_v3 = vmul.f32 %v778_v2, %v770_v59 }
 0x32b   : > { %v780_v4 = vpack.c.bf16 %v779_v3, %v779_v3 }
 0x32d   : > { %1509 = vmatmul.mubr.bf16.vlgmr.msra.gmra.mrb[4].mxu1 %v780_v4 }
 0x400   : > { %v888_v19 = vpop.f32.mrb[4].mxu1 }
 0x401   : > { %v889_v20 = vadd.f32 %v1381_v18, %v888_v19  ;;  %v1510_v21 = vpop.f32.mrb[5].mxu1 }
 0x402   : > { %v891_v22 = vpop.f32.mrb[6].mxu1 }
 0x403   : > { %v894_v23 = vmul.f32 0.5, %v889_v20  ;;  %v1511_v24 = vpop.f32.mrb[7].mxu1 }
 0x405   : > { %1649 = vtanh.f32 %v894_v23 }
 0x40f   : > { %v1650_v25 = vpop.eup %1649 }
 0x410   : > { %v896_v26 = vmul.f32 0.5, %v1650_v25 }
 0x412   : > { %v897_v27 = vadd.f32 0.5, %v896_v26 }
 0x414   : > { %v898_v28 = vmul.f32 %v897_v27, %v889_v20 }
 0x416   : > { %v899_v29 = vpack.c.bf16 %v898_v28, %v898_v28 }
 0x418   : > { %1041 = vmatmul.mubr.bf16.vlgmr.msra.gmra.mrb[8].mxu0 %v899_v29 }
 0x4eb   : > { %v1042_v37 = vpop.f32.mrb[8].mxu0 }
 0x4ec   : > { %v1043_v38 = vadd.f32 %v1042_v37, %v921_v35  ;;  %v1044_v39 = vpop.f32.mrb[9].mxu0 }
 0x4ed   : > { %v1045_v41 = vadd.f32 %v1044_v39, %v925_v36  ;;  %v1046_v42 = vpop.f32.mrb[10].mxu0 }
 0x4ee   : > { %1086 = vst [vmem:[%s445_s25] sm:$0xff] %v1043_v38  ;;  %v1047_v43 = vpop.f32.mrb[11].mxu0 }
 0x4ef   : > { %v1056_v44 = vsub.f32 %v1406_v40, %v1045_v41 }
 0x4f0   : > { %1730 = shalt.err (!%p1727_p4)
}
 0x4f1   : > { %s1731_s17 = scalar_lea.hbm %s2176_s26, 128  ;;  %s1735_s15 = scalar_lea.hbm %s2270_s7, 512 }
 0x4f2   : > { %p1732_p10 = scmp.ne.s32.totalorder %s2176_s26, %s1731_s17  ;;  %p1736_p5 = scmp.lt.u32.totalorder %s2176_s26, %s2270_s7 }
 0x4f3   : > { %p1737_p8 = scmp.lt.u32.totalorder %s1735_s15, %s1731_s17  ;;  %p1739_p2 = scmp.lt.u32.totalorder %s1731_s17, %s2176_s26 }
 0x4f4   : > { %p1733_p1 = pnand %p1732_p10, %p2289_p11 }
 0x4f5   : > { %p1738_p13 = por %p1737_p8, %p1736_p5 }
 0x4f6   : > { %p1734_p3 = pneg %p1733_p1 }
 0x4f7   : > { %p1740_p12 = por %p1739_p2, %p1738_p13 }
 0x4f9   : > { %p1741_p6 = pnand %p1740_p12, %p1734_p3 }
 0x4fb   : > { %1744 = shalt.err (!%p1741_p6)
}
 0x4fc   : > { %1519 = dma.vmem_to_hbm [thread:$0]  (%p2289_p11), %s2178_s23, 128, %s2176_s26, %s1089_s12   ;;  %v1058_v45 = vand.u32 2147483647, %v1056_v44  ;;  %v1057_v56 = vmax.f32 %v1056_v44, 0.0  ;;  %v1407_v59 = vld [vmem:[%s2269_s6 + $0x1] ss:$0 sm:$0xff] }
 0x4fd   : > { %v1408_v0 = vld [vmem:[%s2269_s6 + $0x2] ss:$0 sm:$0xff]  ;;  %s452_s2 = scalar_lea.vmem [#allocation8], %s1318_s13  ;;  %s2215_s25 = scalar_lea.hbm %s2271_s8, %s1411_s11 }
 0x4fe   : > { %v1059_v46 = vsub.f32 0.0, %v1058_v45  ;;  %s1122_s21 = sshll.u32 %s452_s2, 4  ;;  %s1094_s22 = scalar_lea.sflag [#allocation9], %s2048_s16  ;;  %s2217_s21 = int_to_ptr.vmem [resolvable:$true] %s1122_s21 }
 0x4ff   : > { %s1745_s15 = scalar_lea.vmem %s2217_s21, 128  ;;  %s1847_s13 = smov [#allocation8]  }
 0x500   : > { %v1060_v47 = vmul.f32 1.442695, %v1059_v46  ;;  %p1746_p7 = scmp.ne.s32.totalorder %s2217_s21, %s1745_s15  ;;  %s1749_s14 = sshll.u32 %s1847_s13, 4  ;;  %s1750_s14 = int_to_ptr.vmem [resolvable:$false] %s1749_s14 }
 0x501   : > { %s1751_s30 = scalar_lea.vmem %s1750_s14, 256  ;;  %p1752_p4 = scmp.lt.s32.totalorder %s2217_s21, %s1750_s14 }
 0x502   : > { %1651 = vpow2.f32 %v1060_v47  ;;  %p1747_p0 = pnand %p1746_p7, %p2289_p11  ;;  %p1753_p10 = scmp.lt.s32.totalorder %s1751_s30, %s1745_s15 }
 0x504   : > { %p1748_p9 = pneg %p1747_p0  ;;  %p1754_p1 = por %p1753_p10, %p1752_p4 }
 0x506   : > { %p1755_p3 = pnand %p1754_p1, %p1748_p9 }
 0x50c   : > { %v1652_v48 = vpop.eup %1651 }
 0x50d   : > { %v1062_v49 = vadd.f32 1.0, %v1652_v48  ;;  %v1065_v50 = vmul.f32 -0.5, %v1652_v48  ;;  %v1068_v52 = vand.u32 2147483647, %v1652_v48 }
 0x50f   : > { %1653 = vlog2.f32 %v1062_v49  ;;  %v1066_v51 = vadd.f32 1.0, %v1065_v50  ;;  %vm1069_vm3 = vcmp.lt.f32.partialorder %v1068_v52, 0.0004427343 }
 0x511   : > { %v1067_v55 = vmul.f32 %v1652_v48, %v1066_v51 }
 0x519   : > { %v1654_v53 = vpop.eup %1653 }
 0x51a   : > { %v1064_v54 = vmul.f32 0.6931472, %v1654_v53 }
 0x51c   : > { %v1070_v57 = vsel %vm1069_vm3, %v1067_v55, %v1064_v54 }
 0x51d   : > { %v1071_v58 = vadd.f32 %v1070_v57, %v1057_v56 }
 0x51f   : > { %v1072_v60 = vsub.f32 %v1406_v40, %v1071_v58 }
 0x521   : > { %v1077_v61 = vsub.f32 %v1072_v60, %v1407_v59 }
 0x523   : > { %v1078_v62 = vmul.f32 1.442695, %v1077_v61 }
 0x525   : > { %1655 = vpow2.f32 %v1078_v62 }
 0x52f   : > { %v1656_v63 = vpop.eup %1655 }
 0x530   : > { %v1080_v1 = vadd.f32 1.0, %v1656_v63 }
 0x532   : > { %v1085_v2 = vmul.f32 %v1408_v0, %v1080_v1 }
 0x534   : > { %1087 = vst [vmem:[%s452_s2] sm:$0xff] %v1085_v2 }
 0x535   : > { %1758 = shalt.err (!%p1755_p3)
}
 0x536   : > { %s1759_s16 = scalar_lea.hbm %s2215_s25, 128  ;;  %s1763_s23 = scalar_lea.hbm %s2271_s8, 512 }
 0x537   : > { %p1760_p5 = scmp.ne.s32.totalorder %s2215_s25, %s1759_s16  ;;  %p1764_p2 = scmp.lt.u32.totalorder %s2215_s25, %s2271_s8 }
 0x538   : > { %p1765_p12 = scmp.lt.u32.totalorder %s1763_s23, %s1759_s16  ;;  %p1767_p7 = scmp.lt.u32.totalorder %s1759_s16, %s2215_s25 }
 0x539   : > { %p1761_p8 = pnand %p1760_p5, %p2289_p11 }
 0x53a   : > { %p1766_p6 = por %p1765_p12, %p1764_p2 }
 0x53b   : > { %p1762_p13 = pneg %p1761_p8 }
 0x53c   : > { %p1768_p0 = por %p1767_p7, %p1766_p6 }
 0x53e   : > { %p1769_p9 = pnand %p1768_p0, %p1762_p13 }
 0x540   : > { %1772 = shalt.err (!%p1769_p9)
}
 0x541   : > { %1520 = dma.vmem_to_hbm [thread:$0]  (%p2289_p11), %s2217_s21, 128, %s2215_s25, %s1094_s22  }
 0x542 PF: > { %p1538_p4 = scmp.ge.s32.totalorder %s1835_s10, 2  ;;  %s1134_s29 = sand.u32 1, %s1815_s27  }
 0x543   : > { %p2290_p10 = scmp.ne.s32.totalorder %s2283_s20, 0  ;;  %s1135_s2 = scalar_lea.sflag [#allocation4], %s1134_s29 }
 0x545   : > { %p1531_p1 = pnand %p1538_p4, %p2290_p10 }
 0x547   : > { %1806 = dma.done.wait (!%p1531_p1), %s1135_s2, 128  }
 0x548   : > { %1808 = vsyncadd (!%p1531_p1), %s1135_s2, 4294967168  ;;  %s1144_s24 = scalar_lea.sflag [#allocation9], %s1134_s29 }
 0x549   : > { %1810 = dma.done.wait (!%p1531_p1), %s1144_s24, 128  }
 0x54a   : > { %1812 = vsyncadd (!%p1531_p1), %s1144_s24, 4294967168  ;;  %s31_s10 = sadd.s32 1, %s1835_s10   ;;  %s2291_s18 = sld [smem:[#allocation14_spill]] }
 0x54b   : > { %p28_p3 = scmp.ge.s32.totalorder %s31_s10, 6   ;;  %s2292_s29 = sld [smem:[#allocation16_spill]] }
 0x54c   : > { %s2293_s21 = sld [smem:[#allocation15_spill]]  ;;  %s2294_s27 = smov %s1819_s28 }
 0x54d   : > { %s2296_s30 = smov %s1831_s9  ;;  %30 = sbr.rel (!%p28_p3) target bundleno = 12 (0xc), region = 140 }
 0x550   : > { %s2295_s28 = smov %s2291_s18 }
 0x552   : > { %s2297_s9 = smov %s2293_s21 }
 0x554   :  { %1149 = vsyncpa [#allocation3], 1 }
 0x555   :  { %1151 = vsyncpa [#allocation3 + $0x1], 1 }
 0x556   :  { %1152 = vsyncpa [#allocation6], 1 }
 0x557   :  { %1154 = vsyncpa [#allocation6 + $0x1], 1 }
 0x558   :  { %1155 = vsyncpa [#allocation4], 1 }
 0x559   :  { %1157 = vsyncpa [#allocation4 + $0x1], 1 }
 0x55a   :  { %1158 = vsyncpa [#allocation9], 1 }
 0x55b   :  { %1160 = vsyncpa [#allocation9 + $0x1], 1 }

</bundles_post_ra>
